<compile_context>
chip_gen: v6e
topology: v6e:2x2x1
jax: 0.10.0
libtpu: 0.0.40
codegen_flags: <defaults>
</compile_context>

<pallas_src>
import math
import functools

import jax
import jax.numpy as jnp
from jax.experimental import pallas as pl
from jax.experimental.pallas import tpu as pltpu


# ---------------------------------------------------------------------------
# Sinusoidal table (same math as the PyTorch module's __init__).
# ---------------------------------------------------------------------------
def make_positional_encoding_table(d_model: int, max_len: int = 5000) -> jnp.ndarray:
    position = jnp.arange(0, max_len, dtype=jnp.float32)[:, None]             # (max_len, 1)
    div_term = jnp.exp(
        jnp.arange(0, d_model, 2, dtype=jnp.float32) * (-math.log(10000.0) / d_model)
    )                                                                         # (ceil(D/2),)
    angles = position * div_term                                              # (max_len, ceil(D/2))
    pe = jnp.zeros((max_len, d_model), dtype=jnp.float32)
    pe = pe.at[:, 0::2].set(jnp.sin(angles))
    # Exact for even d_model (the PyTorch reference errors for odd d_model).
    pe = pe.at[:, 1::2].set(jnp.cos(angles)[:, : d_model // 2])
    return pe


# ---------------------------------------------------------------------------
# Kernels.
# ---------------------------------------------------------------------------
def _pe_add_kernel(x_ref, pe_ref, o_ref):
    # x_ref / o_ref: (1, TS, L); pe_ref: (TS, L) -- broadcast add over batch.
    o_ref[...] = x_ref[...] + pe_ref[...][None, :, :]


def _pe_add_dropout_kernel(x_ref, pe_ref, bits_ref, o_ref, *,
                           threshold: int, inv_keep: float):
    # Inverted dropout via an integer threshold on raw uint32 bits:
    #   P(keep) = P(bits >= threshold) = 1 - p.
    # Single fused select; no int->float conversion of the random bits.
    y = x_ref[...] + pe_ref[...][None, :, :]
    keep = bits_ref[...] >= jnp.uint32(threshold)
    o_ref[...] = jnp.where(keep, y * inv_keep, 0.0)


# ---------------------------------------------------------------------------
# Tiling helpers.
# ---------------------------------------------------------------------------
def _lane_dense_view(S: int, D: int):
    """Pick (R, L) so the last (lane) dim is a multiple of 128 when possible."""
    if D % 128 == 0:
        return S, D
    if (S * D) % 128 == 0:
        return (S * D) // 128, 128
    return S, D  # fallback: masked partial stores, still correct


def _choose_row_tile(R: int, L: int, itemsize: int) -> int:
    """~2 MiB per x block; multiple of 8 rows, or the full R if it is small."""
    target_rows = max(8, (2 * 1024 * 1024) // max(1, L * itemsize))
    ts = min(R, target_rows)
    ts = (ts // 8) * 8
    if ts <= 0 or ts >= R:
        return R
    return ts


# ---------------------------------------------------------------------------
# Forward wrapper.
# ---------------------------------------------------------------------------
def positional_encoding_forward(x, pe_table, *, dropout_p: float = 0.1,
                                training: bool = False, rng_key=None):
    """x: (B, S, D); returns x + pe[:S] (with inverted dropout when training)."""
    B, S, D = x.shape
    # Slice + cast the table outside the kernel (halves pe traffic if x is bf16).
    pe = pe_table[:S, :].astype(x.dtype)                                      # (S, D)

    # Lane-dense view: collapse (S, D) so the block's last dim is a multiple
    # of 128 when possible (avoids masked vst for small D).
    R, L = _lane_dense_view(S, D)
    xk = x.reshape(B, R, L)
    pek = pe.reshape(R, L)

    itemsize = jnp.dtype(x.dtype).itemsize
    ts = _choose_row_tile(R, L, itemsize)
    n_s = pl.cdiv(R, ts)

    # Grid: PE-row tiles OUTER, batch INNER -> pe's block index is constant
    # across consecutive inner steps, so Mosaic can skip re-DMAing pe.
    grid = (n_s, B)
    x_spec = pl.BlockSpec((1, ts, L), lambda s, b: (b, s, 0))
    pe_spec = pl.BlockSpec((ts, L), lambda s, b: (s, 0))
    out_spec = pl.BlockSpec((1, ts, L), lambda s, b: (b, s, 0))
    out_shape = jax.ShapeDtypeStruct((B, R, L), x.dtype)

    cparams = pltpu.CompilerParams(
        dimension_semantics=("parallel", "parallel"),
        vmem_limit_bytes=32 * 1024 * 1024,
    )

    if (not training) or dropout_p == 0.0:
        # Dropout is identity in eval mode (nn.Dropout semantics).
        out = pl.pallas_call(
            _pe_add_kernel,
            out_shape=out_shape,
            grid_spec=pltpu.PrefetchScalarGridSpec(
                num_scalar_prefetch=0,
                grid=grid,
                in_specs=[x_spec, pe_spec],
                out_specs=out_spec,
            ),
            compiler_params=cparams,
            input_output_aliases={0: 0},
            cost_estimate=pl.CostEstimate(
                flops=B * R * L,
                transcendentals=0,
                bytes_accessed=(2 * B * R * L + R * L) * itemsize,
            ),
        )(xk, pek)
        return out.reshape(B, S, D)

    if not (0.0 <= dropout_p < 1.0):
        raise ValueError("dropout_p must be in [0, 1) for the training path")
    if rng_key is None:
        rng_key = jax.random.PRNGKey(0)

    # Random bits are drawn with jax.random outside the kernel so the kernel
    # also runs under the Pallas interpreter (pltpu.prng_* is TPU-only).
    # TODO(synk): on real TPU hardware, pltpu.prng_seed/prng_random_bits inside
    # the kernel (seeded per (s, b) grid step) would avoid streaming these bits
    # from HBM; PyTorch's dropout RNG stream cannot be bit-matched either way.
    bits = jax.random.bits(rng_key, (B, R, L), dtype=jnp.uint32)
    threshold = min(int(round(dropout_p * float(2 ** 32))), 2 ** 32 - 1)
    inv_keep = 1.0 / (1.0 - dropout_p)
    bits_spec = pl.BlockSpec((1, ts, L), lambda s, b: (b, s, 0))

    out = pl.pallas_call(
        functools.partial(_pe_add_dropout_kernel,
                          threshold=threshold, inv_keep=inv_keep),
        out_shape=out_shape,
        grid_spec=pltpu.PrefetchScalarGridSpec(
            num_scalar_prefetch=0,
            grid=grid,
            in_specs=[x_spec, pe_spec, bits_spec],
            out_specs=out_spec,
        ),
        compiler_params=cparams,
        cost_estimate=pl.CostEstimate(
            flops=3 * B * R * L,
            transcendentals=0,
            bytes_accessed=(2 * B * R * L + R * L) * itemsize + B * R * L * 4,
        ),
    )(xk, pek, bits)
    return out.reshape(B, S, D)


# ---------------------------------------------------------------------------
# Demo / self-check.
# ---------------------------------------------------------------------------
if __name__ == "__main__":
    B, S, D = 2, 8, 32
    max_len = 64  # small table for the demo (module default is 5000)

    key = jax.random.PRNGKey(0)
    kx, kd = jax.random.split(key)
    x = jax.random.normal(kx, (B, S, D), dtype=jnp.float32)

    pe_table = make_positional_encoding_table(D, max_len)
    ref = x + pe_table[None, :S, :]

    # Eval-mode forward (dropout = identity), matches PyTorch module.eval().
    out = jax.block_until_ready(
        positional_encoding_forward(x, pe_table, dropout_p=0.1, training=False)
    )
    assert out.shape == (B, S, D)
    assert jnp.allclose(out, ref, atol=1e-6, rtol=1e-6)

    # Training-mode forward (inverted dropout): every element is either 0 or
    # the reference value scaled by 1/(1-p).
    p = 0.1
    out_tr = jax.block_until_ready(
        positional_encoding_forward(x, pe_table, dropout_p=p, training=True,
                                    rng_key=kd)
    )
    assert out_tr.shape == (B, S, D)
    scaled = ref / (1.0 - p)
    ok = jnp.isclose(out_tr, scaled, atol=1e-5, rtol=1e-5) | (out_tr == 0.0)
    assert bool(jnp.all(ok))

    print("KERNEL_OK")
</pallas_src>

<mosaic_0001>
module attributes {stable_mosaic.version = 11 : i64} {
  func.func @_pe_add_kernel(%arg0: i32, %arg1: i32, %arg2: memref<1x2x128xf32, #tpu.memory_space<vmem>>, %arg3: memref<2x128xf32, #tpu.memory_space<vmem>>, %arg4: memref<1x2x128xf32, #tpu.memory_space<vmem>>) attributes {dimension_semantics = [#tpu.dimension_semantics<parallel>, #tpu.dimension_semantics<parallel>], iteration_bounds = array<i64: 1, 2>, scalar_prefetch = 0 : i64, scratch_operands = 0 : i64, tpu.core_type = #tpu.core_type<tc>, window_params = [{transform_indices = @transform_0, window_bounds = array<i64: 1, 2, 128>}, {transform_indices = @transform_1, window_bounds = array<i64: 2, 128>}, {transform_indices = @transform_2, window_bounds = array<i64: 1, 2, 128>}]} {
    %c0 = arith.constant 0 : index
    %c0_0 = arith.constant 0 : index
    %c0_1 = arith.constant 0 : index
    %0 = vector.load %arg2[%c0, %c0_0, %c0_1] : memref<1x2x128xf32, #tpu.memory_space<vmem>>, vector<1x2x128xf32>
    %c0_2 = arith.constant 0 : index
    %c0_3 = arith.constant 0 : index
    %1 = vector.load %arg3[%c0_2, %c0_3] : memref<2x128xf32, #tpu.memory_space<vmem>>, vector<2x128xf32>
    %2 = vector.shape_cast %1 : vector<2x128xf32> to vector<1x2x128xf32>
    %3 = arith.addf %0, %2 : vector<1x2x128xf32>
    %c0_4 = arith.constant 0 : index
    %c0_5 = arith.constant 0 : index
    %c0_6 = arith.constant 0 : index
    %4 = vector.load %arg4[%c0_4, %c0_5, %c0_6] : memref<1x2x128xf32, #tpu.memory_space<vmem>>, vector<1x2x128xf32>
    tpu.vector_store %arg4[%c0_4, %c0_5, %c0_6], %3 {strides = array<i32>} : memref<1x2x128xf32, #tpu.memory_space<vmem>>, vector<1x2x128xf32>,
    return
  }
  func.func @transform_0(%arg0: i32, %arg1: i32) -> (i32, i32, i32) {
    %c0_i32 = arith.constant 0 : i32
    %c0_i32_0 = arith.constant 0 : i32
    return %arg1, %arg0, %c0_i32 : i32, i32, i32
  }
  func.func @transform_1(%arg0: i32, %arg1: i32) -> (i32, i32) {
    %c0_i32 = arith.constant 0 : i32
    %c0_i32_0 = arith.constant 0 : i32
    return %arg0, %c0_i32 : i32, i32
  }
  func.func @transform_2(%arg0: i32, %arg1: i32) -> (i32, i32, i32) {
    %c0_i32 = arith.constant 0 : i32
    %c0_i32_0 = arith.constant 0 : i32
    return %arg1, %arg0, %c0_i32 : i32, i32, i32
  }
}

</mosaic_0001>

<bundles_post_ra>
// kernel: tpu_custom_call.1
= control target key start
LH: loop header
LB: loop body
LE: loop exit
PB: predicated region body
PF: predicated region fallthrough
CT: control target
= control target key end

     0   :  { %7 = vsyncpa [#allocation3], 0  ;;  %s647_s0 = inlined_call_operand.hbm [shape: f32[2,2,128], index: 0, kind: input, shape index: {}, may-alias: {0,2}]   ;;  %s648_s1 = inlined_call_operand.vmem [shape: f32[2,128], index: 1, kind: input, shape index: {}]   ;;  %s649_s2 = inlined_call_operand.hbm [shape: f32[2,2,128], index: 2, kind: output, shape index: {}, may-alias: {0,2}]  }
   0x1   :  { %9 = vsyncpa [#allocation3 + $0x1], 0 }
   0x2   :  { %10 = vsyncpa [#allocation4], 0 }
   0x3   :  { %12 = vsyncpa [#allocation4 + $0x1], 0  ;;  %s510_s9 = smov 0   ;;  %s512_s10 = smov 0  }
   0x4   :  { %s514_s11 = smov 0   ;;  %s516_s12 = smov 0  }
   0x5   :  { %s518_s13 = smov 0   ;;  %s520_s14 = smov 0  }
   0x6 LB: > { %s307_s15 = sadd.s32 4294967295, %s491_s14   ;;  %s308_s16 = sadd.s32 4294967294, %s491_s14   ;;  %s491_s14 = sphi %s520_s14, %s18_s14   ;;  %s487_s13 = sphi %s518_s13, %s661_s13   ;;  %s483_s12 = sphi %s516_s12, %s660_s12   ;;  %s479_s11 = sphi %s514_s11, %s659_s11   ;;  %s475_s10 = sphi %s512_s10, %s658_s10   ;;  %s471_s9 = sphi %s510_s9, %s657_s9  }
   0x7   : > { %s27_s17 = sadd.s32 1, %s487_s13  ;;  %s39_s18 = sadd.s32 1, %s479_s11 }
   0x8   : > { %p28_p0 = scmp.ge.s32.totalorder %s27_s17, 2  ;;  %p46_p1 = scmp.ne.s32.totalorder %s479_s11, %s475_s10 }
   0x9   : > { %p47_p2 = scmp.eq.s32.totalorder %s491_s14, 0  ;;  %p52_p3 = scmp.ne.s32.totalorder %s475_s10, %s471_s9 }
   0xa   : > { %s663_s17 = smov (%p28_p0, %s27_s17), 0  ;;  %p53_p5 = scmp.eq.s32.totalorder %s307_s15, 0 }
   0xb   : > { %p551_p4 = por %p47_p2, %p46_p1  ;;  %s34_s20 = ssub.s32 %s487_s13, %s663_s17 }
   0xc   : > { %p104_p6 = scmp.eq.s32.totalorder %s307_s15, 1  ;;  %p37_p7 = scmp.eq.s32.totalorder %s34_s20, 0 }
   0xd   : > { %p557_p8 = por %p53_p5, %p52_p3  ;;  %p110_p10 = scmp.eq.s32.totalorder %s308_s16, 1 }
   0xe   : > { %p561_p9 = por %p104_p6, %p46_p1  ;;  %p333_p13 = scmp.lt.s32.totalorder %s491_s14, 2 }
   0xf   : > { %s566_s23 = scalar_select %p37_p7, %s479_s11, %s39_s18  }
  0x10   : > { %p568_p11 = por %p110_p10, %p52_p3  ;;  %s137_s25 = sand.u32 1, %s479_s11  }
  0x11   : > { %s312_s26 = sshll.u32 %s137_s25, 1  ;;  %s313_s27 = sshll.u32 %s487_s13, 5 }
  0x12   : > { %s653_s24 = scalar_select %p568_p11, 1, 0 }
  0x13   : > { %s147_s30 = scalar_lea.hbm %s647_s0, %s313_s27  ;;  %s141_s3 = scalar_lea.vmem [#allocation2], %s312_s26 }
  0x14   : > { %s149_s4 = sshll.u32 %s141_s3, 4  ;;  %p581_p0 = pnand %p333_p13, %p551_p4  ;;  %s150_s4 = int_to_ptr.vmem [resolvable:$true] %s149_s4 }
  0x15   : > { %p314_p1 = scmp.ge.s32.totalorder %s491_s14, 1  ;;  %p154_p2 = scmp.lt.s32.totalorder %s491_s14, 3 }
  0x16   : > { %s138_s6 = scalar_lea.sflag [#allocation3], %s137_s25  ;;  %p385_p3 = pneg %p581_p0 }
  0x17   : > { %s396_s7 = scalar_lea.vmem %s150_s4, 32  ;;  %s493_s8 = smov [#allocation2]  }
  0x18   : > { %p397_p5 = scmp.ne.s32.totalorder %s150_s4, %s396_s7  ;;  %s401_s15 = sshll.u32 %s493_s8, 4  ;;  %s402_s15 = int_to_ptr.vmem [resolvable:$false] %s401_s15 }
  0x19   : > { %s403_s16 = scalar_lea.vmem %s402_s15, 64  ;;  %p404_p10 = scmp.lt.s32.totalorder %s150_s4, %s402_s15 }
  0x1a   : > { %p399_p6 = pnand %p397_p5, %p385_p3  ;;  %p405_p12 = scmp.lt.s32.totalorder %s403_s16, %s396_s7 }
  0x1c   : > { %p400_p7 = pneg %p399_p6  ;;  %p406_p4 = por %p405_p12, %p404_p10 }
  0x1e   : > { %p407_p13 = pnand %p406_p4, %p400_p7 }
  0x20   : > { %410 = shalt.err (!%p407_p13)
}
  0x21   : > { %328 = dma.hbm_to_vmem [thread:$0]  (!%p581_p0), %s147_s30, 32, %s150_s4, %s138_s6  }
  0x22   : > { %p155_p11 = pnand %p314_p1, %p154_p2 }
  0x23   : > { %s596_s18 = sand.u32 (!%p155_p11), 1, %s475_s10  }
  0x24   : > { %158 = sbr.rel (%p155_p11) target bundleno = 66 (0x42), region = 28  ;;  %s315_s19 = sshll.u32 (!%p155_p11), %s596_s18, 1 }
  0x25   : > { %s161_s20 = scalar_lea.sflag (!%p155_p11), [#allocation3], %s596_s18  ;;  %s164_s25 = scalar_lea.vmem (!%p155_p11), [#allocation2], %s315_s19 }
  0x29   : > { %462 = dma.done.wait (%p557_p8), %s161_s20, 32  }
  0x2a   : > { %464 = vsyncadd (%p557_p8), %s161_s20, 4294967264  ;;  %s188_s26 = scalar_lea.vmem [#allocation5], %s315_s19  ;;  %s318_s28 = sshll.u32 %s483_s12, 5  ;;  %v193_v0 = vld [vmem:[%s164_s25] sm:$0x3] }
  0x2b   : > { %s212_s27 = sshll.u32 %s188_s26, 4  ;;  %v194_v1 = vld [vmem:[%s648_s1] sm:$0x3]  ;;  %s210_s5 = scalar_lea.hbm %s649_s2, %s318_s28  ;;  %s213_s27 = int_to_ptr.vmem [resolvable:$true] %s212_s27 }
  0x2c   : > { %v195_v2 = vadd.f32 %v194_v1, %v193_v0  ;;  %s198_s21 = scalar_lea.sflag [#allocation4], %s596_s18  ;;  %s411_s6 = scalar_lea.vmem %s213_s27, 32 }
  0x2d   : > { %p412_p8 = scmp.ne.s32.totalorder %s213_s27, %s411_s6  ;;  %s494_s7 = smov [#allocation5]  }
  0x2e   : > { %196 = vst [vmem:[%s188_s26] sm:$0x3] %v195_v2  ;;  %s415_s12 = sshll.u32 %s494_s7, 4  ;;  %s416_s12 = int_to_ptr.vmem [resolvable:$false] %s415_s12 }
  0x2f   : > { %p413_p11 = pnand %p412_p8, %p561_p9  ;;  %s417_s8 = scalar_lea.vmem %s416_s12, 64 }
  0x30   : > { %p418_p0 = scmp.lt.s32.totalorder %s213_s27, %s416_s12  ;;  %p419_p1 = scmp.lt.s32.totalorder %s417_s8, %s411_s6 }
  0x31   : > { %p414_p12 = pneg %p413_p11 }
  0x32   : > { %p420_p2 = por %p419_p1, %p418_p0 }
  0x34   : > { %p421_p3 = pnand %p420_p2, %p414_p12 }
  0x36   : > { %424 = shalt.err (!%p421_p3)
}
  0x37   : > { %s425_s15 = scalar_lea.hbm %s210_s5, 32  ;;  %s429_s19 = scalar_lea.hbm %s649_s2, 64 }
  0x38   : > { %p426_p5 = scmp.ne.s32.totalorder %s210_s5, %s425_s15  ;;  %p430_p10 = scmp.lt.s32.totalorder %s210_s5, %s649_s2 }
  0x39   : > { %p431_p4 = scmp.lt.s32.totalorder %s429_s19, %s425_s15 }
  0x3a   : > { %p427_p6 = pnand %p426_p5, %p561_p9 }
  0x3b   : > { %p432_p13 = por %p431_p4, %p430_p10 }
  0x3c   : > { %p428_p7 = pneg %p427_p6 }
  0x3e   : > { %p433_p8 = pnand %p432_p13, %p428_p7 }
  0x40   : > { %436 = shalt.err (!%p433_p8)
}
  0x41   : > { %323 = dma.vmem_to_hbm [thread:$0]  (%p561_p9), %s213_s27, 32, %s210_s5, %s198_s21  }
  0x42 PF: > { %s224_s26 = sand.u32 1, %s471_s9   ;;  %p655_p11 = scmp.ne.s32.totalorder %s653_s24, 0 }
  0x43   : > { %p656_p12 = scmp.ge.s32.totalorder %s491_s14, 2  ;;  %s225_s28 = scalar_lea.sflag [#allocation4], %s224_s26 }
  0x45   : > { %p330_p0 = pnand %p656_p12, %p655_p11 }
  0x47   : > { %p331_p1 = pneg %p330_p0 }
  0x49   : > { %466 = dma.done.wait (%p331_p1), %s225_s28, 32  }
  0x4a   : > { %468 = vsyncadd (%p331_p1), %s225_s28, 4294967264  ;;  %s18_s14 = sadd.s32 1, %s491_s14   ;;  %s657_s9 = smov %s475_s10 }
  0x4b   : > { %p15_p2 = scmp.ge.s32.totalorder %s18_s14, 4   ;;  %s658_s10 = smov %s479_s11 }
  0x4c   : > { %s659_s11 = smov %s566_s23  ;;  %s660_s12 = smov %s487_s13 }
  0x4d   : > { %s661_s13 = smov %s663_s17  ;;  %17 = sbr.rel (!%p15_p2) target bundleno = 6 (0x6), region = 76 }
  0x52   :  { %230 = vsyncpa [#allocation3], 1 }
  0x53   :  { %232 = vsyncpa [#allocation3 + $0x1], 1 }
  0x54   :  { %233 = vsyncpa [#allocation4], 1 }
  0x55   :  { %235 = vsyncpa [#allocation4 + $0x1], 1 }

</bundles_post_ra>
